<compile_context>
chip_gen: v6e
topology: v6e:2x2x1
jax: 0.10.0
libtpu: 0.0.40
codegen_flags: <defaults>
</compile_context>

<pallas_src>
import functools
import numpy as np
import jax
import jax.numpy as jnp
from jax.experimental import pallas as pl
from jax.experimental.pallas import tpu as pltpu

_BN_EPS = 1e-5
_VMEM_LIMIT = 48 * 1024 * 1024


def _round_up(x, m):
    return (x + m - 1) // m * m


# ----------------------------------------------------------------------------
# Tile selection: pick targets first, then pad dims up to even multiples.
# ----------------------------------------------------------------------------
def _pick_m_tile(M):
    Mp8 = _round_up(M, 8)
    if Mp8 <= 512:
        return Mp8, Mp8
    nm = -(-Mp8 // 512)
    tm = _round_up(-(-Mp8 // nm), 8)
    return tm, nm * tm


def _pick_k_tile(K):
    Kp128 = _round_up(K, 128)
    if Kp128 <= 1024:
        return Kp128, Kp128
    best_tk, best_kp = 1024, _round_up(Kp128, 1024)
    for tk in range(1024, 127, -128):
        kp = _round_up(Kp128, tk)
        if kp < best_kp:
            best_tk, best_kp = tk, kp
    return best_tk, best_kp


def _pick_n_tile(N, Mp):
    # Collapse the N grid for small-M (deep, numerous 1x1) layers.
    n_cap = 2048 if Mp <= 128 else (1024 if Mp <= 256 else 512)
    tn = min(_round_up(N, 128), n_cap)
    return tn, _round_up(N, tn)


# ----------------------------------------------------------------------------
# Tiled matmul kernel (1x1 convs, stem / stride-2 3x3 fallback)
# ----------------------------------------------------------------------------
def _matmul_affine_kernel(x_ref, w_ref, scale_ref, shift_ref, *rest,
                          relu, has_res, multi_k):
    if has_res:
        res_ref, *rest = rest
    else:
        res_ref = None
    if multi_k:
        o_ref, acc_ref = rest
    else:
        (o_ref,) = rest
        acc_ref = None

    def epilogue(y):
        y = y * scale_ref[...] + shift_ref[...]
        if has_res:
            y = y + res_ref[...].astype(jnp.float32)
        if relu:
            y = jnp.maximum(y, 0.0)
        o_ref[...] = y.astype(o_ref.dtype)

    if multi_k:
        @pl.when(pl.program_id(2) == 0)
        def _():
            acc_ref[...] = jnp.zeros_like(acc_ref)

        acc_ref[...] += jnp.dot(x_ref[...], w_ref[...],
                                preferred_element_type=jnp.float32)

        @pl.when(pl.program_id(2) == pl.num_programs(2) - 1)
        def _():
            epilogue(acc_ref[...])
    else:
        epilogue(jnp.dot(x_ref[...], w_ref[...],
                         preferred_element_type=jnp.float32))


def matmul_affine(x, w, scale, shift, residual=None, *, relu):
    """bf16-out relu?((x @ w) * scale + shift + residual?); bf16 MXU inputs,
    f32 accumulation.  M/N/K are padded up to the chosen tile multiples."""
    M, K = x.shape
    N = w.shape[1]
    tm, Mp = _pick_m_tile(M)
    tk, Kp = _pick_k_tile(K)
    tn, Np = _pick_n_tile(N, Mp)
    nk = Kp // tk
    multi_k = nk > 1
    has_res = residual is not None

    xb = x.astype(jnp.bfloat16)
    if (M, K) != (Mp, Kp):
        xb = jnp.pad(xb, ((0, Mp - M), (0, Kp - K)))
    wb = w.astype(jnp.bfloat16)
    if (K, N) != (Kp, Np):
        wb = jnp.pad(wb, ((0, Kp - K), (0, Np - N)))
    sc = scale if N == Np else jnp.pad(scale, ((0, 0), (0, Np - N)))
    sh = shift if N == Np else jnp.pad(shift, ((0, 0), (0, Np - N)))

    in_specs = [
        pl.BlockSpec((tm, tk), lambda i, j, k: (i, k)),
        pl.BlockSpec((tk, tn), lambda i, j, k: (k, j)),
        pl.BlockSpec((1, tn), lambda i, j, k: (0, j)),
        pl.BlockSpec((1, tn), lambda i, j, k: (0, j)),
    ]
    args = [xb, wb, sc, sh]
    if has_res:
        rb = residual.astype(jnp.bfloat16)
        if (M, N) != (Mp, Np):
            rb = jnp.pad(rb, ((0, Mp - M), (0, Np - N)))
        in_specs.append(pl.BlockSpec((tm, tn), lambda i, j, k: (i, j)))
        args.append(rb)

    out = pl.pallas_call(
        functools.partial(_matmul_affine_kernel, relu=relu, has_res=has_res,
                          multi_k=multi_k),
        out_shape=jax.ShapeDtypeStruct((Mp, Np), jnp.bfloat16),
        grid=(Mp // tm, Np // tn, nk),
        in_specs=in_specs,
        out_specs=pl.BlockSpec((tm, tn), lambda i, j, k: (i, j)),
        scratch_shapes=([pltpu.VMEM((tm, tn), jnp.float32)] if multi_k else []),
        compiler_params=pltpu.CompilerParams(
            dimension_semantics=("parallel", "parallel", "arbitrary"),
            vmem_limit_bytes=_VMEM_LIMIT),
    )(*args)
    if (M, N) != (Mp, Np):
        out = out[:M, :N]
    return out


# ----------------------------------------------------------------------------
# Fused implicit-im2col 3x3 / stride-1 conv kernel
# ----------------------------------------------------------------------------
def _conv3x3_kernel(x_ref, w_ref, scale_ref, shift_ref, o_ref, *,
                    wp, t_rows, relu):
    # x_ref: (Lp, C) flattened, zero-padded activation of one image (bf16).
    # o_ref: (t_rows, O) rows of the flattened (OH, Wp) padded output grid.
    r0 = pl.program_id(1) * t_rows
    n_out = w_ref.shape[2]
    acc = jnp.zeros((t_rows, n_out), jnp.float32)
    for di in range(3):
        for dj in range(3):
            xs = x_ref[pl.ds(r0 + di * wp + dj, t_rows), :]
            acc = acc + jnp.dot(xs, w_ref[di * 3 + dj],
                                preferred_element_type=jnp.float32)
    y = acc * scale_ref[...] + shift_ref[...]
    if relu:
        y = jnp.maximum(y, 0.0)
    o_ref[...] = y.astype(o_ref.dtype)


@functools.partial(jax.jit, static_argnames=("relu",))
def conv3x3_bn_fused(x, w, bn, *, relu=True):
    """3x3 / stride 1 / padding 1 conv + folded BN (+ ReLU) with im2col fused
    into the kernel: the 9x-expanded cols matrix never touches HBM."""
    B, H, W, C = x.shape
    O = w.shape[0]
    OH, OW = H, W
    Hp, Wp = H + 2, W + 2
    m_out = OH * Wp                          # columns >= OW of the grid are garbage
    n_rows = -(-m_out // 512)
    t_rows = _round_up(-(-m_out // n_rows), 8)
    m_pad = n_rows * t_rows
    # Enough tail rows so the last tap's slice (offset 2*Wp+2) stays in bounds.
    l_needed = m_pad + 2 * Wp + 2
    extra = max(0, -(-(l_needed - Hp * Wp) // Wp))
    lp = (Hp + extra) * Wp

    xp = jnp.pad(x.astype(jnp.bfloat16), ((0, 0), (1, 1 + extra), (1, 1), (0, 0)))
    xf = xp.reshape(B, lp, C)

    w_taps = jnp.transpose(w, (2, 3, 1, 0)).reshape(9, C, O).astype(jnp.bfloat16)
    scale = (bn["gamma"] / jnp.sqrt(bn["var"] + _BN_EPS)).reshape(1, O)
    shift = (bn["beta"] - bn["mean"] * scale[0]).reshape(1, O)

    out = pl.pallas_call(
        functools.partial(_conv3x3_kernel, wp=Wp, t_rows=t_rows, relu=relu),
        out_shape=jax.ShapeDtypeStruct((B, m_pad, O), jnp.bfloat16),
        grid=(B, n_rows),
        in_specs=[
            pl.BlockSpec((None, lp, C), lambda b, r: (b, 0, 0)),
            pl.BlockSpec((9, C, O), lambda b, r: (0, 0, 0)),
            pl.BlockSpec((1, O), lambda b, r: (0, 0)),
            pl.BlockSpec((1, O), lambda b, r: (0, 0)),
        ],
        out_specs=pl.BlockSpec((None, t_rows, O), lambda b, r: (b, r, 0)),
        compiler_params=pltpu.CompilerParams(
            dimension_semantics=("parallel", "parallel"),
            vmem_limit_bytes=_VMEM_LIMIT),
    )(xf, w_taps, scale, shift)

    if m_pad != m_out:
        out = out[:, :m_out, :]
    return out.reshape(B, OH, Wp, O)[:, :, :OW, :]


# ----------------------------------------------------------------------------
# 1x1 conv (direct matmul) and general im2col fallback
# ----------------------------------------------------------------------------
@functools.partial(jax.jit, static_argnames=("stride", "relu"))
def conv1x1_bn(x, w, bn, *, stride=1, relu=True, residual=None):
    B, H, W, C = x.shape
    O = w.shape[0]
    if stride != 1:
        x = x[:, ::stride, ::stride, :]
        H, W = x.shape[1], x.shape[2]
    x2 = x.reshape(B * H * W, C)
    w2 = w.reshape(O, C).T
    scale = (bn["gamma"] / jnp.sqrt(bn["var"] + _BN_EPS)).reshape(1, O)
    shift = (bn["beta"] - bn["mean"] * scale[0]).reshape(1, O)
    res2 = None if residual is None else residual.reshape(B * H * W, O)
    y = matmul_affine(x2, w2, scale, shift, residual=res2, relu=relu)
    return y.reshape(B, H, W, O)


def _im2col_nhwc(x, kh, kw, stride, padding):
    B, H, W, C = x.shape
    OH = (H + 2 * padding - kh) // stride + 1
    OW = (W + 2 * padding - kw) // stride + 1
    xp = jnp.pad(x, ((0, 0), (padding, padding), (padding, padding), (0, 0)))
    patches = []
    for i in range(kh):
        for j in range(kw):
            patches.append(xp[:, i: i + stride * (OH - 1) + 1: stride,
                               j: j + stride * (OW - 1) + 1: stride, :])
    cols = jnp.concatenate(patches, axis=-1)
    return cols.reshape(B * OH * OW, kh * kw * C), OH, OW


@functools.partial(jax.jit, static_argnames=("stride", "padding", "relu"))
def conv2d_bn_im2col(x, w, bn, *, stride, padding, relu):
    # TODO(synk): the 7x7 stem and the three stride-2 3x3 convs still go
    # through materialized im2col; everything else is fused / direct.
    B = x.shape[0]
    O, I, KH, KW = w.shape
    cols, OH, OW = _im2col_nhwc(x, KH, KW, stride, padding)
    w_mat = jnp.transpose(w, (2, 3, 1, 0)).reshape(KH * KW * I, O)
    scale = (bn["gamma"] / jnp.sqrt(bn["var"] + _BN_EPS)).reshape(1, O)
    shift = (bn["beta"] - bn["mean"] * scale[0]).reshape(1, O)
    out2d = matmul_affine(cols, w_mat, scale, shift, relu=relu)
    return out2d.reshape(B, OH, OW, O)


# ----------------------------------------------------------------------------
# Max pool (stem) — plain XLA windowed max
# ----------------------------------------------------------------------------
@jax.jit
def maxpool2d_3x3_s2_p1(x):
    # TODO(synk): maxpool stays a plain-XLA 9-way strided max (no Pallas kernel).
    B, H, W, C = x.shape
    xp = jnp.pad(x, ((0, 0), (1, 1), (1, 1), (0, 0)), constant_values=-jnp.inf)
    OH = (H + 2 - 3) // 2 + 1
    OW = (W + 2 - 3) // 2 + 1
    out = jnp.full((B, OH, OW, C), -jnp.inf, x.dtype)
    for i in range(3):
        for j in range(3):
            out = jnp.maximum(
                out, xp[:, i: i + 2 * (OH - 1) + 1: 2,
                           j: j + 2 * (OW - 1) + 1: 2, :])
    return out


# ----------------------------------------------------------------------------
# Fused global-avg-pool + dual classifier heads kernel
# ----------------------------------------------------------------------------
def _head_kernel(x_ref, w1_ref, b1_ref, w2_ref, b2_ref, o_ref, *, inv_hw):
    # Global average pool over the spatial axis, then both heads fused:
    # Conv1d(2048->1024, k=3, pad=1) on a length-1 sequence (center tap only)
    # + ReLU + Dropout(identity, eval) + Linear, block-diagonal for the heads.
    feat = jnp.sum(x_ref[...].astype(jnp.float32), axis=1) * inv_hw
    h = jnp.dot(feat.astype(jnp.bfloat16), w1_ref[...],
                preferred_element_type=jnp.float32) + b1_ref[...]
    h = jnp.maximum(h, 0.0)
    o_ref[...] = jnp.dot(h.astype(jnp.bfloat16), w2_ref[...],
                         preferred_element_type=jnp.float32) + b2_ref[...]


@functools.partial(jax.jit, static_argnames=("num_genres", "num_decades"))
def heads_forward(h, gcw, gcb, glw, glb, dcw, dcb, dlw, dlb,
                  *, num_genres, num_decades):
    B, OH, OW, C = h.shape
    G, D = num_genres, num_decades
    HW = OH * OW
    Bp = _round_up(B, 8)

    xf = h.reshape(B, HW, C).astype(jnp.bfloat16)
    if Bp != B:
        xf = jnp.pad(xf, ((0, Bp - B), (0, 0), (0, 0)))

    w1 = jnp.concatenate([gcw[:, :, 1].T, dcw[:, :, 1].T], axis=1).astype(jnp.bfloat16)
    b1 = jnp.concatenate([gcb, dcb]).reshape(1, -1)
    hid = glw.shape[1]
    out_pad = _round_up(G + D, 128)
    w2 = jnp.zeros((w1.shape[1], out_pad), jnp.float32)
    w2 = w2.at[:hid, :G].set(glw.T)
    w2 = w2.at[hid:, G:G + D].set(dlw.T)
    w2 = w2.astype(jnp.bfloat16)
    b2 = jnp.zeros((1, out_pad), jnp.float32)
    b2 = b2.at[0, :G].set(glb)
    b2 = b2.at[0, G:G + D].set(dlb)

    out = pl.pallas_call(
        functools.partial(_head_kernel, inv_hw=1.0 / HW),
        out_shape=jax.ShapeDtypeStruct((Bp, out_pad), jnp.float32),
        grid=(1,),
        in_specs=[
            pl.BlockSpec(xf.shape, lambda i: (0, 0, 0)),
            pl.BlockSpec(w1.shape, lambda i: (0, 0)),
            pl.BlockSpec(b1.shape, lambda i: (0, 0)),
            pl.BlockSpec(w2.shape, lambda i: (0, 0)),
            pl.BlockSpec(b2.shape, lambda i: (0, 0)),
        ],
        out_specs=pl.BlockSpec((Bp, out_pad), lambda i: (0, 0)),
        compiler_params=pltpu.CompilerParams(
            dimension_semantics=("arbitrary",),
            vmem_limit_bytes=_VMEM_LIMIT),
    )(xf, w1, b1, w2, b2)
    return out[:B, :G], out[:B, G:G + D]


# ----------------------------------------------------------------------------
# ResNet50 orchestration (channels-last, bf16 activations end-to-end)
# ----------------------------------------------------------------------------
def bottleneck_forward(x, blk, stride):
    if "dconv" in blk:
        identity = conv1x1_bn(x, blk["dconv"], blk["dbn"], stride=stride, relu=False)
    else:
        identity = x
    out = conv1x1_bn(x, blk["conv1"], blk["bn1"], stride=1, relu=True)
    if stride == 1:
        out = conv3x3_bn_fused(out, blk["conv2"], blk["bn2"], relu=True)
    else:
        out = conv2d_bn_im2col(out, blk["conv2"], blk["bn2"],
                               stride=stride, padding=1, relu=True)
    # Residual add + ReLU fused into conv3's matmul epilogue.
    out = conv1x1_bn(out, blk["conv3"], blk["bn3"], stride=1, relu=True,
                     residual=identity)
    return out


def resnet_classifier_forward(params, x):
    # x: (B, C, H, W) PyTorch layout -> NHWC bf16 once, backbone channels-last.
    h = jnp.transpose(x, (0, 2, 3, 1)).astype(jnp.bfloat16)
    h = conv2d_bn_im2col(h, params["stem_conv"], params["stem_bn"],
                         stride=2, padding=3, relu=True)
    h = maxpool2d_3x3_s2_p1(h)
    for stage_idx, blocks in enumerate(params["layers"]):
        stage_stride = 1 if stage_idx == 0 else 2
        for bidx, blk in enumerate(blocks):
            h = bottleneck_forward(h, blk, stage_stride if bidx == 0 else 1)
    # adaptive avg pool + resnet.fc = Identity + both heads fused in one call.
    G = params["genre_lin_w"].shape[0]
    D = params["decade_lin_w"].shape[0]
    return heads_forward(h,
                         params["genre_conv_w"], params["genre_conv_b"],
                         params["genre_lin_w"], params["genre_lin_b"],
                         params["decade_conv_w"], params["decade_conv_b"],
                         params["decade_lin_w"], params["decade_lin_b"],
                         num_genres=G, num_decades=D)


# ----------------------------------------------------------------------------
# Deterministic parameter initialization
# ----------------------------------------------------------------------------
class KeyGen:
    def __init__(self, key):
        self.key = key
        self.i = 0

    def __call__(self):
        self.i += 1
        return jax.random.fold_in(self.key, self.i)


def init_conv(key, out_c, in_c, kh, kw):
    fan_in = in_c * kh * kw
    return (jax.random.normal(key, (out_c, in_c, kh, kw), jnp.float32)
            / np.sqrt(fan_in))


def init_bn(key, c):
    k1, k2, k3, k4 = jax.random.split(key, 4)
    return {
        "gamma": 1.0 + 0.1 * jax.random.normal(k1, (c,), jnp.float32),
        "beta": 0.1 * jax.random.normal(k2, (c,), jnp.float32),
        "mean": 0.1 * jax.random.normal(k3, (c,), jnp.float32),
        "var": 1.0 + 0.1 * jax.random.uniform(k4, (c,), jnp.float32),
    }


def init_bottleneck(kg, in_c, planes, downsample):
    blk = {
        "conv1": init_conv(kg(), planes, in_c, 1, 1), "bn1": init_bn(kg(), planes),
        "conv2": init_conv(kg(), planes, planes, 3, 3), "bn2": init_bn(kg(), planes),
        "conv3": init_conv(kg(), planes * 4, planes, 1, 1),
        "bn3": init_bn(kg(), planes * 4),
    }
    if downsample:
        blk["dconv"] = init_conv(kg(), planes * 4, in_c, 1, 1)
        blk["dbn"] = init_bn(kg(), planes * 4)
    return blk


def init_params(key, num_genres, num_decades):
    kg = KeyGen(key)
    p = {
        "stem_conv": init_conv(kg(), 64, 3, 7, 7),
        "stem_bn": init_bn(kg(), 64),
    }
    layers = []
    in_c = 64
    for planes, nblocks in [(64, 3), (128, 4), (256, 6), (512, 3)]:
        blocks = []
        for b in range(nblocks):
            blocks.append(init_bottleneck(kg, in_c, planes, downsample=(b == 0)))
            in_c = planes * 4
        layers.append(blocks)
    p["layers"] = layers

    def init_head(out_dim):
        cw = jax.random.normal(kg(), (1024, 2048, 3), jnp.float32) / np.sqrt(2048 * 3)
        cb = 0.01 * jax.random.normal(kg(), (1024,), jnp.float32)
        lw = jax.random.normal(kg(), (out_dim, 1024), jnp.float32) / np.sqrt(1024)
        lb = 0.01 * jax.random.normal(kg(), (out_dim,), jnp.float32)
        return cw, cb, lw, lb

    (p["genre_conv_w"], p["genre_conv_b"],
     p["genre_lin_w"], p["genre_lin_b"]) = init_head(num_genres)
    (p["decade_conv_w"], p["decade_conv_b"],
     p["decade_lin_w"], p["decade_lin_b"]) = init_head(num_decades)
    return p


# ----------------------------------------------------------------------------
if __name__ == "__main__":
    num_genres, num_decades = 10, 8
    root = jax.random.PRNGKey(0)
    params = init_params(jax.random.fold_in(root, 1), num_genres, num_decades)
    x = jax.random.normal(jax.random.fold_in(root, 2), (2, 3, 32, 32), jnp.float32)

    genre_logits, decade_logits = resnet_classifier_forward(params, x)
    jax.block_until_ready((genre_logits, decade_logits))

    assert genre_logits.shape == (2, num_genres), genre_logits.shape
    assert decade_logits.shape == (2, num_decades), decade_logits.shape
    assert genre_logits.dtype == jnp.float32 and decade_logits.dtype == jnp.float32
    assert bool(jnp.all(jnp.isfinite(genre_logits)))
    assert bool(jnp.all(jnp.isfinite(decade_logits)))
    print("KERNEL_OK")
</pallas_src>

<mosaic_0001>
module attributes {stable_mosaic.version = 11 : i64} {
  func.func @_matmul_affine_kernel(%arg0: i32, %arg1: i32, %arg2: i32, %arg3: memref<512x256xbf16, #tpu.memory_space<vmem>>, %arg4: memref<256x128xbf16, #tpu.memory_space<vmem>>, %arg5: memref<1x128xf32, #tpu.memory_space<vmem>>, %arg6: memref<1x128xf32, #tpu.memory_space<vmem>>, %arg7: memref<512x128xbf16, #tpu.memory_space<vmem>>) attributes {dimension_semantics = [#tpu.dimension_semantics<parallel>, #tpu.dimension_semantics<parallel>, #tpu.dimension_semantics<arbitrary>], iteration_bounds = array<i64: 1, 1, 1>, scalar_prefetch = 0 : i64, scratch_operands = 0 : i64, tpu.core_type = #tpu.core_type<tc>, window_params = [{transform_indices = @transform_0, window_bounds = array<i64: 512, 256>}, {transform_indices = @transform_1, window_bounds = array<i64: 256, 128>}, {transform_indices = @transform_2, window_bounds = array<i64: 1, 128>}, {transform_indices = @transform_3, window_bounds = array<i64: 1, 128>}, {transform_indices = @transform_4, window_bounds = array<i64: 512, 128>}]} {
    %c0 = arith.constant 0 : index
    %c0_0 = arith.constant 0 : index
    %0 = vector.load %arg3[%c0, %c0_0] : memref<512x256xbf16, #tpu.memory_space<vmem>>, vector<512x256xbf16>
    %c0_1 = arith.constant 0 : index
    %c0_2 = arith.constant 0 : index
    %1 = vector.load %arg4[%c0_1, %c0_2] : memref<256x128xbf16, #tpu.memory_space<vmem>>, vector<256x128xbf16>
    %cst = arith.constant dense<0.000000e+00> : vector<512x128xf32>
    %2 = tpu.matmul %0, %1, %cst {dimension_numbers = #tpu.dot_dimension_numbers<[1], [0], [0], [1], [0, 0, 1, 1], [], []>} : vector<512x256xbf16>, vector<256x128xbf16>, vector<512x128xf32> -> vector<512x128xf32>
    %c0_3 = arith.constant 0 : index
    %c0_4 = arith.constant 0 : index
    %3 = vector.load %arg5[%c0_3, %c0_4] : memref<1x128xf32, #tpu.memory_space<vmem>>, vector<1x128xf32>
    %4 = vector.broadcast %3 : vector<1x128xf32> to vector<512x128xf32>
    %5 = arith.mulf %2, %4 : vector<512x128xf32>
    %c0_5 = arith.constant 0 : index
    %c0_6 = arith.constant 0 : index
    %6 = vector.load %arg6[%c0_5, %c0_6] : memref<1x128xf32, #tpu.memory_space<vmem>>, vector<1x128xf32>
    %7 = vector.broadcast %6 : vector<1x128xf32> to vector<512x128xf32>
    %8 = arith.addf %5, %7 : vector<512x128xf32>
    %cst_7 = arith.constant 0.000000e+00 : f32
    %9 = vector.broadcast %cst_7 : f32 to vector<512x128xf32>
    %10 = arith.maximumf %8, %9 : vector<512x128xf32>
    %11 = arith.truncf %10 : vector<512x128xf32> to vector<512x128xbf16>
    %c0_8 = arith.constant 0 : index
    %c0_9 = arith.constant 0 : index
    %12 = vector.load %arg7[%c0_8, %c0_9] : memref<512x128xbf16, #tpu.memory_space<vmem>>, vector<512x128xbf16>
    tpu.vector_store %arg7[%c0_8, %c0_9], %11 {strides = array<i32>} : memref<512x128xbf16, #tpu.memory_space<vmem>>, vector<512x128xbf16>,
    return
  }
  func.func @transform_0(%arg0: i32, %arg1: i32, %arg2: i32) -> (i32, i32) {
    %c0_i32 = arith.constant 0 : i32
    return %arg0, %arg2 : i32, i32
  }
  func.func @transform_1(%arg0: i32, %arg1: i32, %arg2: i32) -> (i32, i32) {
    %c0_i32 = arith.constant 0 : i32
    return %arg2, %arg1 : i32, i32
  }
  func.func @transform_2(%arg0: i32, %arg1: i32, %arg2: i32) -> (i32, i32) {
    %c0_i32 = arith.constant 0 : i32
    %c0_i32_0 = arith.constant 0 : i32
    return %c0_i32, %arg1 : i32, i32
  }
  func.func @transform_3(%arg0: i32, %arg1: i32, %arg2: i32) -> (i32, i32) {
    %c0_i32 = arith.constant 0 : i32
    %c0_i32_0 = arith.constant 0 : i32
    return %c0_i32, %arg1 : i32, i32
  }
  func.func @transform_4(%arg0: i32, %arg1: i32, %arg2: i32) -> (i32, i32) {
    %c0_i32 = arith.constant 0 : i32
    return %arg0, %arg1 : i32, i32
  }
}

</mosaic_0001>

<bundles_post_ra>
// kernel: conv2d_bn_im2col.1
= control target key start
LH: loop header
LB: loop body
LE: loop exit
PB: predicated region body
PF: predicated region fallthrough
CT: control target
= control target key end

     0   :  { %v1933_v1 = vmov 0   ;;  %s2375_s0 = inlined_call_operand.vmem [shape: bf16[512,256], index: 0, kind: input, shape index: {}]   ;;  %s2376_s1 = inlined_call_operand.vmem [shape: bf16[256,128], index: 1, kind: input, shape index: {}]   ;;  %s2377_s2 = inlined_call_operand.vmem [shape: f32[1,128], index: 2, kind: input, shape index: {}]   ;;  %s2378_s3 = inlined_call_operand.vmem [shape: f32[1,128], index: 3, kind: input, shape index: {}]   ;;  %s2379_s4 = inlined_call_operand.hbm [shape: bf16[512,128], index: 4, kind: output, shape index: {}]  }
   0x1   :  { %v1799_v0 = vld [vmem:[%s2376_s1 + $0x38] sm:$0xff]   ;;  %531 = vmatprep.subr.bf16.mxu0 %v1933_v1  ;;  %1763 = vmatprep.subr.bf16.mxu1 %v1933_v1  ;;  %v1800_v2 = vld [vmem:[%s2376_s1 + $0x30] sm:$0xff]   ;;  %v1801_v3 = vld [vmem:[%s2376_s1 + $0x28] sm:$0xff]  }
   0x2   :  { %532 = vmatpush1.bf16.msra.mxu0 %v1799_v0  ;;  %1779 = vmatpush1.bf16.msra.mxu1 %v1799_v0  ;;  %v1802_v4 = vld [vmem:[%s2376_s1 + $0x20] sm:$0xff]   ;;  %v1803_v5 = vld [vmem:[%s2376_s1 + $0x18] sm:$0xff]   ;;  %v1804_v7 = vld [vmem:[%s2376_s1 + $0x10] sm:$0xff]  }
   0x3   :  { %533 = vmatprep.subr.bf16.mxu0 %v1933_v1  ;;  %1764 = vmatprep.subr.bf16.mxu1 %v1933_v1  ;;  %v1817_v6 = vld [vmem:[%s2375_s0 + $0x4] ss:$8 sps:$4 sm:$0xff]   ;;  %v1807_v11 = vld [vmem:[%s2376_s1 + $0x78] sm:$0xff]   ;;  %v1808_v12 = vld [vmem:[%s2376_s1 + $0x70] sm:$0xff]  }
   0x4   :  { %v1820_v8 = vld [vmem:[%s2375_s0 + $0x104] ss:$8 sps:$4 sm:$0xff]   ;;  %563 = vmatprep.mubr.bf16.mxu0 %v1817_v6  ;;  %v1811_v15 = vld [vmem:[%s2376_s1 + $0x58] sm:$0xff]   ;;  %v1812_v16 = vld [vmem:[%s2376_s1 + $0x50] sm:$0xff]  }
   0x5   :  { %691 = vmatprep.mubr.bf16.mxu1 %v1820_v8  ;;  %v1805_v9 = vld [vmem:[%s2376_s1 + $0x8] sm:$0xff]   ;;  %v1806_v10 = vld [vmem:[%s2376_s1] sm:$0xff]  }
   0x6   :  { %534 = vmatpush1.bf16.msra.mxu0 %v1800_v2  ;;  %1780 = vmatpush1.bf16.msra.mxu1 %v1800_v2  ;;  %v1809_v13 = vld [vmem:[%s2376_s1 + $0x68] sm:$0xff]   ;;  %v1810_v14 = vld [vmem:[%s2376_s1 + $0x60] sm:$0xff]  }
   0x7   :  { %535 = vmatprep.subr.bf16.mxu0 %v1933_v1  ;;  %1765 = vmatprep.subr.bf16.mxu1 %v1933_v1  ;;  %v1813_v17 = vld [vmem:[%s2376_s1 + $0x48] sm:$0xff]   ;;  %v1814_v18 = vld [vmem:[%s2376_s1 + $0x40] sm:$0xff]  }
   0xa   :  { %536 = vmatpush1.bf16.msra.mxu0 %v1801_v3  ;;  %1781 = vmatpush1.bf16.msra.mxu1 %v1801_v3 }
   0xb   :  { %537 = vmatprep.subr.bf16.mxu0 %v1933_v1  ;;  %1766 = vmatprep.subr.bf16.mxu1 %v1933_v1 }
   0xe   :  { %538 = vmatpush1.bf16.msra.mxu0 %v1802_v4  ;;  %1782 = vmatpush1.bf16.msra.mxu1 %v1802_v4 }
   0xf   :  { %539 = vmatprep.subr.bf16.mxu0 %v1933_v1  ;;  %1767 = vmatprep.subr.bf16.mxu1 %v1933_v1 }
  0x12   :  { %540 = vmatpush1.bf16.msra.mxu0 %v1803_v5  ;;  %1783 = vmatpush1.bf16.msra.mxu1 %v1803_v5 }
  0x13   :  { %541 = vmatprep.subr.bf16.mxu0 %v1933_v1  ;;  %1768 = vmatprep.subr.bf16.mxu1 %v1933_v1 }
  0x16   :  { %542 = vmatpush1.bf16.msra.mxu0 %v1804_v7  ;;  %1784 = vmatpush1.bf16.msra.mxu1 %v1804_v7 }
  0x17   :  { %543 = vmatprep.subr.bf16.mxu0 %v1933_v1  ;;  %1769 = vmatprep.subr.bf16.mxu1 %v1933_v1 }
  0x1a   :  { %544 = vmatpush1.bf16.msra.mxu0 %v1805_v9  ;;  %1785 = vmatpush1.bf16.msra.mxu1 %v1805_v9 }
  0x1b   :  { %545 = vmatprep.subr.bf16.mxu0 %v1933_v1  ;;  %1770 = vmatprep.subr.bf16.mxu1 %v1933_v1 }
  0x1e   :  { %546 = vmatpush1.bf16.msra.mxu0 %v1806_v10  ;;  %1786 = vmatpush1.bf16.msra.mxu1 %v1806_v10 }
  0x1f   :  { %547 = vmatprep.subr.bf16.mxu0 %v1933_v1  ;;  %1771 = vmatprep.subr.bf16.mxu1 %v1933_v1 }
  0x22   :  { %548 = vmatpush2.bf16.msra.mxu0 %v1807_v11  ;;  %1787 = vmatpush2.bf16.msra.mxu1 %v1807_v11 }
  0x23   :  { %549 = vmatprep.subr.bf16.mxu0 %v1933_v1  ;;  %1772 = vmatprep.subr.bf16.mxu1 %v1933_v1 }
  0x26   :  { %550 = vmatpush2.bf16.msra.mxu0 %v1808_v12  ;;  %1788 = vmatpush2.bf16.msra.mxu1 %v1808_v12 }
  0x27   :  { %551 = vmatprep.subr.bf16.mxu0 %v1933_v1  ;;  %1773 = vmatprep.subr.bf16.mxu1 %v1933_v1 }
  0x2a   :  { %552 = vmatpush2.bf16.msra.mxu0 %v1809_v13  ;;  %1789 = vmatpush2.bf16.msra.mxu1 %v1809_v13 }
  0x2b   :  { %553 = vmatprep.subr.bf16.mxu0 %v1933_v1  ;;  %1774 = vmatprep.subr.bf16.mxu1 %v1933_v1 }
  0x2e   :  { %554 = vmatpush2.bf16.msra.mxu0 %v1810_v14  ;;  %1790 = vmatpush2.bf16.msra.mxu1 %v1810_v14 }
  0x2f   :  { %555 = vmatprep.subr.bf16.mxu0 %v1933_v1  ;;  %1775 = vmatprep.subr.bf16.mxu1 %v1933_v1 }
  0x32   :  { %556 = vmatpush2.bf16.msra.mxu0 %v1811_v15  ;;  %1791 = vmatpush2.bf16.msra.mxu1 %v1811_v15 }
  0x33   :  { %557 = vmatprep.subr.bf16.mxu0 %v1933_v1  ;;  %1776 = vmatprep.subr.bf16.mxu1 %v1933_v1 }
  0x36   :  { %558 = vmatpush2.bf16.msra.mxu0 %v1812_v16  ;;  %1792 = vmatpush2.bf16.msra.mxu1 %v1812_v16 }
  0x37   :  { %559 = vmatprep.subr.bf16.mxu0 %v1933_v1  ;;  %1777 = vmatprep.subr.bf16.mxu1 %v1933_v1 }
  0x3a   :  { %560 = vmatpush2.bf16.msra.mxu0 %v1813_v17  ;;  %1793 = vmatpush2.bf16.msra.mxu1 %v1813_v17 }
  0x3b   :  { %9 = vsyncpa [#allocation3], 0  ;;  %561 = vmatprep.subr.bf16.mxu0 %v1933_v1  ;;  %1778 = vmatprep.subr.bf16.mxu1 %v1933_v1  ;;  %v1815_v19 = vld [vmem:[%s2375_s0] ss:$8 sps:$4 sm:$0xff]   ;;  %v1821_v21 = vld [vmem:[%s2375_s0 + $0x14] ss:$8 sps:$4 sm:$0xff]  }
  0x3c   :  { %v1818_v20 = vld [vmem:[%s2375_s0 + $0x100] ss:$8 sps:$4 sm:$0xff]   ;;  %v1823_v22 = vld [vmem:[%s2375_s0 + $0x114] ss:$8 sps:$4 sm:$0xff]   ;;  %v1825_v23 = vld [vmem:[%s2375_s0 + $0x10] ss:$8 sps:$4 sm:$0xff]  }
  0x3d   :  { %v1826_v24 = vld [vmem:[%s2375_s0 + $0x110] ss:$8 sps:$4 sm:$0xff]   ;;  %v1827_v25 = vld [vmem:[%s2375_s0 + $0x24] ss:$8 sps:$4 sm:$0xff]   ;;  %v1831_v27 = vld [vmem:[%s2375_s0 + $0x20] ss:$8 sps:$4 sm:$0xff]  }
  0x3e   :  { %562 = vmatpush2.bf16.msra.mxu0 %v1814_v18  ;;  %1794 = vmatpush2.bf16.msra.mxu1 %v1814_v18  ;;  %v1829_v26 = vld [vmem:[%s2375_s0 + $0x124] ss:$8 sps:$4 sm:$0xff]   ;;  %v1832_v28 = vld [vmem:[%s2375_s0 + $0x120] ss:$8 sps:$4 sm:$0xff]   ;;  %v1833_v29 = vld [vmem:[%s2375_s0 + $0x34] ss:$8 sps:$4 sm:$0xff]  }
  0x3f   :  { %v1835_v30 = vld [vmem:[%s2375_s0 + $0x134] ss:$8 sps:$4 sm:$0xff]   ;;  %v1837_v31 = vld [vmem:[%s2375_s0 + $0x30] ss:$8 sps:$4 sm:$0xff]   ;;  %v1839_v33 = vld [vmem:[%s2375_s0 + $0x44] ss:$8 sps:$4 sm:$0xff]  }
  0x40   :  { %v1838_v32 = vld [vmem:[%s2375_s0 + $0x130] ss:$8 sps:$4 sm:$0xff]   ;;  %v1841_v34 = vld [vmem:[%s2375_s0 + $0x144] ss:$8 sps:$4 sm:$0xff]   ;;  %v1843_v35 = vld [vmem:[%s2375_s0 + $0x40] ss:$8 sps:$4 sm:$0xff]  }
  0x41   :  { %564 = vmatmul.mubr.bf16.vlgmr.msra.gmra.mxu0 %v1815_v19  ;;  %692 = vmatmul.mubr.bf16.vlgmr.msra.gmra.mxu1 %v1818_v20  ;;  %v1844_v36 = vld [vmem:[%s2375_s0 + $0x140] ss:$8 sps:$4 sm:$0xff]   ;;  %v1845_v37 = vld [vmem:[%s2375_s0 + $0x54] ss:$8 sps:$4 sm:$0xff]   ;;  %v1849_v39 = vld [vmem:[%s2375_s0 + $0x50] ss:$8 sps:$4 sm:$0xff]  }
  0x42   :  { %571 = vmatprep.mubr.bf16.mxu0 %v1821_v21  ;;  %699 = vmatprep.mubr.bf16.mxu1 %v1823_v22  ;;  %v1847_v38 = vld [vmem:[%s2375_s0 + $0x154] ss:$8 sps:$4 sm:$0xff]   ;;  %v1850_v40 = vld [vmem:[%s2375_s0 + $0x150] ss:$8 sps:$4 sm:$0xff]   ;;  %v1851_v41 = vld [vmem:[%s2375_s0 + $0x64] ss:$8 sps:$4 sm:$0xff]  }
  0x43   :  { %v1853_v42 = vld [vmem:[%s2375_s0 + $0x164] ss:$8 sps:$4 sm:$0xff]   ;;  %v1855_v43 = vld [vmem:[%s2375_s0 + $0x60] ss:$8 sps:$4 sm:$0xff]   ;;  %v1857_v45 = vld [vmem:[%s2375_s0 + $0x74] ss:$8 sps:$4 sm:$0xff]  }
  0x44   :  { %v1856_v44 = vld [vmem:[%s2375_s0 + $0x160] ss:$8 sps:$4 sm:$0xff]   ;;  %v1859_v46 = vld [vmem:[%s2375_s0 + $0x174] ss:$8 sps:$4 sm:$0xff]   ;;  %v1861_v47 = vld [vmem:[%s2375_s0 + $0x70] ss:$8 sps:$4 sm:$0xff]  }
  0x45   :  { %v1862_v48 = vld [vmem:[%s2375_s0 + $0x170] ss:$8 sps:$4 sm:$0xff]   ;;  %v1863_v49 = vld [vmem:[%s2375_s0 + $0x84] ss:$8 sps:$4 sm:$0xff]   ;;  %v1867_v51 = vld [vmem:[%s2375_s0 + $0x80] ss:$8 sps:$4 sm:$0xff]  }
  0x46   :  { %v1865_v50 = vld [vmem:[%s2375_s0 + $0x184] ss:$8 sps:$4 sm:$0xff]   ;;  %v1868_v52 = vld [vmem:[%s2375_s0 + $0x180] ss:$8 sps:$4 sm:$0xff]   ;;  %v1869_v53 = vld [vmem:[%s2375_s0 + $0x94] ss:$8 sps:$4 sm:$0xff]  }
  0x47   :  { %v1871_v54 = vld [vmem:[%s2375_s0 + $0x194] ss:$8 sps:$4 sm:$0xff]   ;;  %v1873_v55 = vld [vmem:[%s2375_s0 + $0x90] ss:$8 sps:$4 sm:$0xff]   ;;  %v1875_v57 = vld [vmem:[%s2375_s0 + $0xa4] ss:$8 sps:$4 sm:$0xff]  }
  0x48   :  { %v1874_v56 = vld [vmem:[%s2375_s0 + $0x190] ss:$8 sps:$4 sm:$0xff]   ;;  %v1877_v58 = vld [vmem:[%s2375_s0 + $0x1a4] ss:$8 sps:$4 sm:$0xff]   ;;  %v1879_v59 = vld [vmem:[%s2375_s0 + $0xa0] ss:$8 sps:$4 sm:$0xff]  }
  0x49   :  { %572 = vmatmul.mubr.bf16.gmra.mxu0 %v1825_v23  ;;  %700 = vmatmul.mubr.bf16.gmra.mxu1 %v1826_v24  ;;  %v1880_v60 = vld [vmem:[%s2375_s0 + $0x1a0] ss:$8 sps:$4 sm:$0xff]   ;;  %v1881_v61 = vld [vmem:[%s2375_s0 + $0xb4] ss:$8 sps:$4 sm:$0xff]   ;;  %v1885_v63 = vld [vmem:[%s2375_s0 + $0xb0] ss:$8 sps:$4 sm:$0xff]  }
  0x4a   :  { %579 = vmatprep.mubr.bf16.mxu0 %v1827_v25  ;;  %707 = vmatprep.mubr.bf16.mxu1 %v1829_v26  ;;  %v1883_v62 = vld [vmem:[%s2375_s0 + $0x1b4] ss:$8 sps:$4 sm:$0xff]   ;;  %v1886_v0 = vld [vmem:[%s2375_s0 + $0x1b0] ss:$8 sps:$4 sm:$0xff]   ;;  %v1887_v1 = vld [vmem:[%s2375_s0 + $0xc4] ss:$8 sps:$4 sm:$0xff]  }
  0x4b   :  { %v1889_v2 = vld [vmem:[%s2375_s0 + $0x1c4] ss:$8 sps:$4 sm:$0xff]   ;;  %v1891_v3 = vld [vmem:[%s2375_s0 + $0xc0] ss:$8 sps:$4 sm:$0xff]   ;;  %v1893_v5 = vld [vmem:[%s2375_s0 + $0xd4] ss:$8 sps:$4 sm:$0xff]  }
  0x4c   :  { %v1892_v4 = vld [vmem:[%s2375_s0 + $0x1c0] ss:$8 sps:$4 sm:$0xff]   ;;  %v1895_v6 = vld [vmem:[%s2375_s0 + $0x1d4] ss:$8 sps:$4 sm:$0xff]   ;;  %v1897_v7 = vld [vmem:[%s2375_s0 + $0xd0] ss:$8 sps:$4 sm:$0xff]  }
  0x4d   :  { %v1898_v8 = vld [vmem:[%s2375_s0 + $0x1d0] ss:$8 sps:$4 sm:$0xff]   ;;  %v1899_v9 = vld [vmem:[%s2375_s0 + $0xe4] ss:$8 sps:$4 sm:$0xff]   ;;  %v1903_v11 = vld [vmem:[%s2375_s0 + $0xe0] ss:$8 sps:$4 sm:$0xff]  }
  0x4e   :  { %v1901_v10 = vld [vmem:[%s2375_s0 + $0x1e4] ss:$8 sps:$4 sm:$0xff]   ;;  %v1904_v12 = vld [vmem:[%s2375_s0 + $0x1e0] ss:$8 sps:$4 sm:$0xff]   ;;  %v1905_v13 = vld [vmem:[%s2375_s0 + $0xf4] ss:$8 sps:$4 sm:$0xff]  }
  0x4f   :  { %v1907_v14 = vld [vmem:[%s2375_s0 + $0x1f4] ss:$8 sps:$4 sm:$0xff]   ;;  %v1909_v15 = vld [vmem:[%s2375_s0 + $0xf0] ss:$8 sps:$4 sm:$0xff]   ;;  %v2237_v17 = vld [vmem:[%s2377_s2] ss:$0 sm:$0xff] }
  0x50   :  { %v1910_v16 = vld [vmem:[%s2375_s0 + $0x1f0] ss:$8 sps:$4 sm:$0xff]   ;;  %v2243_v21 = vld [vmem:[%s2378_s3] ss:$0 sm:$0xff]  ;;  %s1934_s0 = smov [#allocation2]  }
  0x51   :  { %580 = vmatmul.mubr.bf16.gmra.mxu0 %v1831_v27  ;;  %708 = vmatmul.mubr.bf16.gmra.mxu1 %v1832_v28  ;;  %s1351_s2 = sshll.u32 %s1934_s0, 4  ;;  %s1352_s2 = int_to_ptr.vmem [resolvable:$true] %s1351_s2 }
  0x52   :  { %587 = vmatprep.mubr.bf16.mxu0 %v1833_v29  ;;  %715 = vmatprep.mubr.bf16.mxu1 %v1835_v30  ;;  %s1911_s3 = scalar_lea.vmem %s1352_s2, 4096  ;;  %p1916_p1 = scmp.lt.s32.totalorder %s1352_s2, %s1352_s2 }
  0x53   :  { %p1912_p0 = scmp.ne.s32.totalorder %s1352_s2, %s1911_s3  ;;  %p1917_p2 = scmp.lt.s32.totalorder %s1911_s3, %s1911_s3 }
  0x55   :  { %p1918_p3 = por %p1917_p2, %p1916_p1 }
  0x57   :  { %p1919_p4 = pnand %p1918_p3, %p1912_p0 }
  0x59   :  { %588 = vmatmul.mubr.bf16.gmra.mxu0 %v1837_v31  ;;  %716 = vmatmul.mubr.bf16.gmra.mxu1 %v1838_v32 }
  0x5a   :  { %595 = vmatprep.mubr.bf16.mxu0 %v1839_v33  ;;  %723 = vmatprep.mubr.bf16.mxu1 %v1841_v34 }
  0x61   :  { %596 = vmatmul.mubr.bf16.gmra.mxu0 %v1843_v35  ;;  %724 = vmatmul.mubr.bf16.gmra.mxu1 %v1844_v36 }
  0x62   :  { %603 = vmatprep.mubr.bf16.mxu0 %v1845_v37  ;;  %731 = vmatprep.mubr.bf16.mxu1 %v1847_v38 }
  0x69   :  { %604 = vmatmul.mubr.bf16.gmra.mxu0 %v1849_v39  ;;  %732 = vmatmul.mubr.bf16.gmra.mxu1 %v1850_v40 }
  0x6a   :  { %611 = vmatprep.mubr.bf16.mxu0 %v1851_v41  ;;  %739 = vmatprep.mubr.bf16.mxu1 %v1853_v42 }
  0x71   :  { %612 = vmatmul.mubr.bf16.gmra.mxu0 %v1855_v43  ;;  %740 = vmatmul.mubr.bf16.gmra.mxu1 %v1856_v44 }
  0x72   :  { %619 = vmatprep.mubr.bf16.mxu0 %v1857_v45  ;;  %747 = vmatprep.mubr.bf16.mxu1 %v1859_v46 }
  0x79   :  { %620 = vmatmul.mubr.bf16.gmra.mxu0 %v1861_v47  ;;  %748 = vmatmul.mubr.bf16.gmra.mxu1 %v1862_v48 }
  0x7a   :  { %627 = vmatprep.mubr.bf16.mxu0 %v1863_v49  ;;  %755 = vmatprep.mubr.bf16.mxu1 %v1865_v50 }
  0x81   :  { %628 = vmatmul.mubr.bf16.gmra.mxu0 %v1867_v51  ;;  %756 = vmatmul.mubr.bf16.gmra.mxu1 %v1868_v52 }
  0x82   :  { %635 = vmatprep.mubr.bf16.mxu0 %v1869_v53  ;;  %763 = vmatprep.mubr.bf16.mxu1 %v1871_v54 }
  0x89   :  { %636 = vmatmul.mubr.bf16.gmra.mxu0 %v1873_v55  ;;  %764 = vmatmul.mubr.bf16.gmra.mxu1 %v1874_v56 }
  0x8a   :  { %643 = vmatprep.mubr.bf16.mxu0 %v1875_v57  ;;  %771 = vmatprep.mubr.bf16.mxu1 %v1877_v58 }
  0x91   :  { %644 = vmatmul.mubr.bf16.gmra.mxu0 %v1879_v59  ;;  %772 = vmatmul.mubr.bf16.gmra.mxu1 %v1880_v60 }
  0x92   :  { %651 = vmatprep.mubr.bf16.mxu0 %v1881_v61  ;;  %779 = vmatprep.mubr.bf16.mxu1 %v1883_v62 }
  0x99   :  { %652 = vmatmul.mubr.bf16.gmra.mxu0 %v1885_v63  ;;  %780 = vmatmul.mubr.bf16.gmra.mxu1 %v1886_v0 }
  0x9a   :  { %659 = vmatprep.mubr.bf16.mxu0 %v1887_v1  ;;  %787 = vmatprep.mubr.bf16.mxu1 %v1889_v2 }
  0xa1   :  { %660 = vmatmul.mubr.bf16.gmra.mxu0 %v1891_v3  ;;  %788 = vmatmul.mubr.bf16.gmra.mxu1 %v1892_v4 }
  0xa2   :  { %667 = vmatprep.mubr.bf16.mxu0 %v1893_v5  ;;  %795 = vmatprep.mubr.bf16.mxu1 %v1895_v6 }
  0xa9   :  { %668 = vmatmul.mubr.bf16.gmra.mxu0 %v1897_v7  ;;  %796 = vmatmul.mubr.bf16.gmra.mxu1 %v1898_v8 }
  0xaa   :  { %675 = vmatprep.mubr.bf16.mxu0 %v1899_v9  ;;  %803 = vmatprep.mubr.bf16.mxu1 %v1901_v10 }
  0xb1   :  { %676 = vmatmul.mubr.bf16.gmra.mxu0 %v1903_v11  ;;  %804 = vmatmul.mubr.bf16.gmra.mxu1 %v1904_v12 }
  0xb2   :  { %683 = vmatprep.mubr.bf16.mxu0 %v1905_v13  ;;  %811 = vmatprep.mubr.bf16.mxu1 %v1907_v14 }
  0xb9   :  { %684 = vmatmul.mubr.bf16.gmra.mxu0 %v1909_v15  ;;  %812 = vmatmul.mubr.bf16.gmra.mxu1 %v1910_v16 }
 0x101   :  { %v565_v18 = vpop.f32.mrf.mxu0  ;;  %v693_v19 = vpop.f32.mrf.mxu1 }
 0x102   :  { %v827_v20 = vmul.f32 %v2237_v17, %v565_v18  ;;  %v859_v22 = vmul.f32 %v2237_v17, %v693_v19 }
 0x103   :  { %v567_v23 = vpop.f32.mrf.mxu0  ;;  %v695_v24 = vpop.f32.mrf.mxu1 }
 0x104   :  { %v898_v25 = vadd.f32 %v2243_v21, %v827_v20  ;;  %v930_v26 = vadd.f32 %v2243_v21, %v859_v22 }
 0x105   :  { %v568_v27 = vpop.f32.mrf.mxu0  ;;  %v696_v28 = vpop.f32.mrf.mxu1 }
 0x106   :  { %v828_v29 = vmul.f32 %v2237_v17, %v568_v27  ;;  %v860_v30 = vmul.f32 %v2237_v17, %v696_v28  ;;  %v962_v35 = vmax.f32 %v898_v25, 0.0  ;;  %v994_v36 = vmax.f32 %v930_v26, 0.0 }
 0x107   :  { %v570_v31 = vpop.f32.mrf.mxu0  ;;  %v698_v32 = vpop.f32.mrf.mxu1 }
 0x108   :  { %v899_v33 = vadd.f32 %v2243_v21, %v828_v29  ;;  %v931_v34 = vadd.f32 %v2243_v21, %v860_v30 }
 0x109   :  { %v573_v37 = vpop.f32.mrf.mxu0  ;;  %v701_v38 = vpop.f32.mrf.mxu1 }
 0x10a   :  { %v963_v39 = vmax.f32 %v899_v33, 0.0  ;;  %v995_v40 = vmax.f32 %v931_v34, 0.0  ;;  %v829_v41 = vmul.f32 %v2237_v17, %v573_v37  ;;  %v861_v42 = vmul.f32 %v2237_v17, %v701_v38 }
 0x10b   :  { %v575_v43 = vpop.f32.mrf.mxu0  ;;  %v703_v44 = vpop.f32.mrf.mxu1 }
 0x10c   :  { %v1575_v45 = vpack.c.bf16 %v963_v39, %v962_v35  ;;  %v1655_v46 = vpack.c.bf16 %v995_v40, %v994_v36  ;;  %v900_v47 = vadd.f32 %v2243_v21, %v829_v41  ;;  %v932_v48 = vadd.f32 %v2243_v21, %v861_v42 }
 0x10d   :  { %v576_v49 = vpop.f32.mrf.mxu0  ;;  %v704_v50 = vpop.f32.mrf.mxu1 }
 0x10e   :  { %1576 = vst [vmem:[#allocation2] sm:$0xff] %v1575_v45   ;;  %1747 = vst [vmem:[#allocation2 + $0x80] sm:$0xff] %v1655_v46   ;;  %v830_v51 = vmul.f32 %v2237_v17, %v576_v49  ;;  %v862_v52 = vmul.f32 %v2237_v17, %v704_v50  ;;  %v964_v57 = vmax.f32 %v900_v47, 0.0  ;;  %v996_v58 = vmax.f32 %v932_v48, 0.0 }
 0x10f   :  { %v578_v53 = vpop.f32.mrf.mxu0  ;;  %v706_v54 = vpop.f32.mrf.mxu1 }
 0x110   :  { %v901_v55 = vadd.f32 %v2243_v21, %v830_v51  ;;  %v933_v56 = vadd.f32 %v2243_v21, %v862_v52 }
 0x111   :  { %v581_v59 = vpop.f32.mrf.mxu0  ;;  %v709_v60 = vpop.f32.mrf.mxu1 }
 0x112   :  { %v965_v61 = vmax.f32 %v901_v55, 0.0  ;;  %v997_v62 = vmax.f32 %v933_v56, 0.0  ;;  %v831_v63 = vmul.f32 %v2237_v17, %v581_v59  ;;  %v863_v0 = vmul.f32 %v2237_v17, %v709_v60 }
 0x113   :  { %v583_v1 = vpop.f32.mrf.mxu0  ;;  %v711_v2 = vpop.f32.mrf.mxu1 }
 0x114   :  { %v1580_v3 = vpack.c.bf16 %v965_v61, %v964_v57  ;;  %v1660_v4 = vpack.c.bf16 %v997_v62, %v996_v58  ;;  %v902_v5 = vadd.f32 %v2243_v21, %v831_v63  ;;  %v934_v6 = vadd.f32 %v2243_v21, %v863_v0 }
 0x115   :  { %v584_v7 = vpop.f32.mrf.mxu0  ;;  %v712_v8 = vpop.f32.mrf.mxu1 }
 0x116   :  { %1732 = vst [vmem:[#allocation2 + $0x8] sm:$0xff] %v1580_v3   ;;  %1748 = vst [vmem:[#allocation2 + $0x88] sm:$0xff] %v1660_v4   ;;  %v832_v9 = vmul.f32 %v2237_v17, %v584_v7  ;;  %v864_v10 = vmul.f32 %v2237_v17, %v712_v8  ;;  %v966_v15 = vmax.f32 %v902_v5, 0.0  ;;  %v998_v16 = vmax.f32 %v934_v6, 0.0 }
 0x117   :  { %v586_v11 = vpop.f32.mrf.mxu0  ;;  %v714_v12 = vpop.f32.mrf.mxu1 }
 0x118   :  { %v903_v13 = vadd.f32 %v2243_v21, %v832_v9  ;;  %v935_v14 = vadd.f32 %v2243_v21, %v864_v10 }
 0x119   :  { %v589_v18 = vpop.f32.mrf.mxu0  ;;  %v717_v19 = vpop.f32.mrf.mxu1 }
 0x11a   :  { %v967_v20 = vmax.f32 %v903_v13, 0.0  ;;  %v999_v22 = vmax.f32 %v935_v14, 0.0  ;;  %v833_v23 = vmul.f32 %v2237_v17, %v589_v18  ;;  %v865_v24 = vmul.f32 %v2237_v17, %v717_v19 }
 0x11b   :  { %v591_v25 = vpop.f32.mrf.mxu0  ;;  %v719_v26 = vpop.f32.mrf.mxu1 }
 0x11c   :  { %v1585_v27 = vpack.c.bf16 %v967_v20, %v966_v15  ;;  %v1665_v28 = vpack.c.bf16 %v999_v22, %v998_v16  ;;  %v904_v29 = vadd.f32 %v2243_v21, %v833_v23  ;;  %v936_v30 = vadd.f32 %v2243_v21, %v865_v24 }
 0x11d   :  { %v592_v31 = vpop.f32.mrf.mxu0  ;;  %v720_v32 = vpop.f32.mrf.mxu1 }
 0x11e   :  { %1733 = vst [vmem:[#allocation2 + $0x10] sm:$0xff] %v1585_v27   ;;  %1749 = vst [vmem:[#allocation2 + $0x90] sm:$0xff] %v1665_v28   ;;  %v834_v33 = vmul.f32 %v2237_v17, %v592_v31  ;;  %v866_v34 = vmul.f32 %v2237_v17, %v720_v32  ;;  %v968_v39 = vmax.f32 %v904_v29, 0.0  ;;  %v1000_v40 = vmax.f32 %v936_v30, 0.0 }
 0x11f   :  { %v594_v35 = vpop.f32.mrf.mxu0  ;;  %v722_v36 = vpop.f32.mrf.mxu1 }
 0x120   :  { %v905_v37 = vadd.f32 %v2243_v21, %v834_v33  ;;  %v937_v38 = vadd.f32 %v2243_v21, %v866_v34 }
 0x121   :  { %v597_v41 = vpop.f32.mrf.mxu0  ;;  %v725_v42 = vpop.f32.mrf.mxu1 }
 0x122   :  { %v969_v43 = vmax.f32 %v905_v37, 0.0  ;;  %v1001_v44 = vmax.f32 %v937_v38, 0.0  ;;  %v835_v45 = vmul.f32 %v2237_v17, %v597_v41  ;;  %v867_v46 = vmul.f32 %v2237_v17, %v725_v42 }
 0x123   :  { %v599_v47 = vpop.f32.mrf.mxu0  ;;  %v727_v48 = vpop.f32.mrf.mxu1 }
 0x124   :  { %v1590_v49 = vpack.c.bf16 %v969_v43, %v968_v39  ;;  %v1670_v50 = vpack.c.bf16 %v1001_v44, %v1000_v40  ;;  %v906_v51 = vadd.f32 %v2243_v21, %v835_v45  ;;  %v938_v52 = vadd.f32 %v2243_v21, %v867_v46 }
 0x125   :  { %v600_v53 = vpop.f32.mrf.mxu0  ;;  %v728_v54 = vpop.f32.mrf.mxu1 }
 0x126   :  { %1734 = vst [vmem:[#allocation2 + $0x18] sm:$0xff] %v1590_v49   ;;  %1750 = vst [vmem:[#allocation2 + $0x98] sm:$0xff] %v1670_v50   ;;  %v836_v55 = vmul.f32 %v2237_v17, %v600_v53  ;;  %v868_v56 = vmul.f32 %v2237_v17, %v728_v54  ;;  %v970_v61 = vmax.f32 %v906_v51, 0.0  ;;  %v1002_v62 = vmax.f32 %v938_v52, 0.0 }
 0x127   :  { %v602_v57 = vpop.f32.mrf.mxu0  ;;  %v730_v58 = vpop.f32.mrf.mxu1 }
 0x128   :  { %v907_v59 = vadd.f32 %v2243_v21, %v836_v55  ;;  %v939_v60 = vadd.f32 %v2243_v21, %v868_v56 }
 0x129   :  { %v605_v63 = vpop.f32.mrf.mxu0  ;;  %v733_v0 = vpop.f32.mrf.mxu1 }
 0x12a   :  { %v971_v1 = vmax.f32 %v907_v59, 0.0  ;;  %v1003_v2 = vmax.f32 %v939_v60, 0.0  ;;  %v837_v3 = vmul.f32 %v2237_v17, %v605_v63  ;;  %v869_v4 = vmul.f32 %v2237_v17, %v733_v0 }
 0x12b   :  { %v607_v5 = vpop.f32.mrf.mxu0  ;;  %v735_v6 = vpop.f32.mrf.mxu1 }
 0x12c   :  { %v1595_v7 = vpack.c.bf16 %v971_v1, %v970_v61  ;;  %v1675_v8 = vpack.c.bf16 %v1003_v2, %v1002_v62  ;;  %v908_v9 = vadd.f32 %v2243_v21, %v837_v3  ;;  %v940_v10 = vadd.f32 %v2243_v21, %v869_v4 }
 0x12d   :  { %v608_v11 = vpop.f32.mrf.mxu0  ;;  %v736_v12 = vpop.f32.mrf.mxu1 }
 0x12e   :  { %1735 = vst [vmem:[#allocation2 + $0x20] sm:$0xff] %v1595_v7   ;;  %1751 = vst [vmem:[#allocation2 + $0xa0] sm:$0xff] %v1675_v8   ;;  %v838_v13 = vmul.f32 %v2237_v17, %v608_v11  ;;  %v870_v14 = vmul.f32 %v2237_v17, %v736_v12  ;;  %v972_v20 = vmax.f32 %v908_v9, 0.0  ;;  %v1004_v22 = vmax.f32 %v940_v10, 0.0 }
 0x12f   :  { %v610_v15 = vpop.f32.mrf.mxu0  ;;  %v738_v16 = vpop.f32.mrf.mxu1 }
 0x130   :  { %v909_v18 = vadd.f32 %v2243_v21, %v838_v13  ;;  %v941_v19 = vadd.f32 %v2243_v21, %v870_v14 }
 0x131   :  { %v613_v23 = vpop.f32.mrf.mxu0  ;;  %v741_v24 = vpop.f32.mrf.mxu1 }
 0x132   :  { %v973_v25 = vmax.f32 %v909_v18, 0.0  ;;  %v1005_v26 = vmax.f32 %v941_v19, 0.0  ;;  %v839_v27 = vmul.f32 %v2237_v17, %v613_v23  ;;  %v871_v28 = vmul.f32 %v2237_v17, %v741_v24 }
 0x133   :  { %v615_v29 = vpop.f32.mrf.mxu0  ;;  %v743_v30 = vpop.f32.mrf.mxu1 }
 0x134   :  { %v1600_v31 = vpack.c.bf16 %v973_v25, %v972_v20  ;;  %v1680_v32 = vpack.c.bf16 %v1005_v26, %v1004_v22  ;;  %v910_v33 = vadd.f32 %v2243_v21, %v839_v27  ;;  %v942_v34 = vadd.f32 %v2243_v21, %v871_v28 }
 0x135   :  { %v616_v35 = vpop.f32.mrf.mxu0  ;;  %v744_v36 = vpop.f32.mrf.mxu1 }
 0x136   :  { %1736 = vst [vmem:[#allocation2 + $0x28] sm:$0xff] %v1600_v31   ;;  %1752 = vst [vmem:[#allocation2 + $0xa8] sm:$0xff] %v1680_v32   ;;  %v840_v37 = vmul.f32 %v2237_v17, %v616_v35  ;;  %v872_v38 = vmul.f32 %v2237_v17, %v744_v36  ;;  %v974_v43 = vmax.f32 %v910_v33, 0.0  ;;  %v1006_v44 = vmax.f32 %v942_v34, 0.0 }
 0x137   :  { %v618_v39 = vpop.f32.mrf.mxu0  ;;  %v746_v40 = vpop.f32.mrf.mxu1 }
 0x138   :  { %v911_v41 = vadd.f32 %v2243_v21, %v840_v37  ;;  %v943_v42 = vadd.f32 %v2243_v21, %v872_v38 }
 0x139   :  { %v621_v45 = vpop.f32.mrf.mxu0  ;;  %v749_v46 = vpop.f32.mrf.mxu1 }
 0x13a   :  { %v975_v47 = vmax.f32 %v911_v41, 0.0  ;;  %v1007_v48 = vmax.f32 %v943_v42, 0.0  ;;  %v841_v49 = vmul.f32 %v2237_v17, %v621_v45  ;;  %v873_v50 = vmul.f32 %v2237_v17, %v749_v46 }
 0x13b   :  { %v623_v51 = vpop.f32.mrf.mxu0  ;;  %v751_v52 = vpop.f32.mrf.mxu1 }
 0x13c   :  { %v1605_v53 = vpack.c.bf16 %v975_v47, %v974_v43  ;;  %v1685_v54 = vpack.c.bf16 %v1007_v48, %v1006_v44  ;;  %v912_v55 = vadd.f32 %v2243_v21, %v841_v49  ;;  %v944_v56 = vadd.f32 %v2243_v21, %v873_v50 }
 0x13d   :  { %v624_v57 = vpop.f32.mrf.mxu0  ;;  %v752_v58 = vpop.f32.mrf.mxu1 }
 0x13e   :  { %1737 = vst [vmem:[#allocation2 + $0x30] sm:$0xff] %v1605_v53   ;;  %1753 = vst [vmem:[#allocation2 + $0xb0] sm:$0xff] %v1685_v54   ;;  %v842_v59 = vmul.f32 %v2237_v17, %v624_v57  ;;  %v874_v60 = vmul.f32 %v2237_v17, %v752_v58  ;;  %v976_v1 = vmax.f32 %v912_v55, 0.0  ;;  %v1008_v2 = vmax.f32 %v944_v56, 0.0 }
 0x13f   :  { %v626_v61 = vpop.f32.mrf.mxu0  ;;  %v754_v62 = vpop.f32.mrf.mxu1 }
 0x140   :  { %v913_v63 = vadd.f32 %v2243_v21, %v842_v59  ;;  %v945_v0 = vadd.f32 %v2243_v21, %v874_v60 }
 0x141   :  { %v629_v3 = vpop.f32.mrf.mxu0  ;;  %v757_v4 = vpop.f32.mrf.mxu1 }
 0x142   :  { %v977_v5 = vmax.f32 %v913_v63, 0.0  ;;  %v1009_v6 = vmax.f32 %v945_v0, 0.0  ;;  %v843_v7 = vmul.f32 %v2237_v17, %v629_v3  ;;  %v875_v8 = vmul.f32 %v2237_v17, %v757_v4 }
 0x143   :  { %v631_v9 = vpop.f32.mrf.mxu0  ;;  %v759_v10 = vpop.f32.mrf.mxu1 }
 0x144   :  { %v1610_v11 = vpack.c.bf16 %v977_v5, %v976_v1  ;;  %v1690_v12 = vpack.c.bf16 %v1009_v6, %v1008_v2  ;;  %v914_v13 = vadd.f32 %v2243_v21, %v843_v7  ;;  %v946_v14 = vadd.f32 %v2243_v21, %v875_v8 }
 0x145   :  { %v632_v15 = vpop.f32.mrf.mxu0  ;;  %v760_v16 = vpop.f32.mrf.mxu1 }
 0x146   :  { %1738 = vst [vmem:[#allocation2 + $0x38] sm:$0xff] %v1610_v11   ;;  %1754 = vst [vmem:[#allocation2 + $0xb8] sm:$0xff] %v1690_v12   ;;  %v844_v18 = vmul.f32 %v2237_v17, %v632_v15  ;;  %v876_v19 = vmul.f32 %v2237_v17, %v760_v16  ;;  %v978_v25 = vmax.f32 %v914_v13, 0.0  ;;  %v1010_v26 = vmax.f32 %v946_v14, 0.0 }
 0x147   :  { %v634_v20 = vpop.f32.mrf.mxu0  ;;  %v762_v22 = vpop.f32.mrf.mxu1 }
 0x148   :  { %v915_v23 = vadd.f32 %v2243_v21, %v844_v18  ;;  %v947_v24 = vadd.f32 %v2243_v21, %v876_v19 }
 0x149   :  { %v637_v27 = vpop.f32.mrf.mxu0  ;;  %v765_v28 = vpop.f32.mrf.mxu1 }
 0x14a   :  { %v979_v29 = vmax.f32 %v915_v23, 0.0  ;;  %v1011_v30 = vmax.f32 %v947_v24, 0.0  ;;  %v845_v31 = vmul.f32 %v2237_v17, %v637_v27  ;;  %v877_v32 = vmul.f32 %v2237_v17, %v765_v28 }
 0x14b   :  { %v639_v33 = vpop.f32.mrf.mxu0  ;;  %v767_v34 = vpop.f32.mrf.mxu1 }
 0x14c   :  { %v1615_v35 = vpack.c.bf16 %v979_v29, %v978_v25  ;;  %v1695_v36 = vpack.c.bf16 %v1011_v30, %v1010_v26  ;;  %v916_v37 = vadd.f32 %v2243_v21, %v845_v31  ;;  %v948_v38 = vadd.f32 %v2243_v21, %v877_v32 }
 0x14d   :  { %v640_v39 = vpop.f32.mrf.mxu0  ;;  %v768_v40 = vpop.f32.mrf.mxu1 }
 0x14e   :  { %1739 = vst [vmem:[#allocation2 + $0x40] sm:$0xff] %v1615_v35   ;;  %1755 = vst [vmem:[#allocation2 + $0xc0] sm:$0xff] %v1695_v36   ;;  %v846_v41 = vmul.f32 %v2237_v17, %v640_v39  ;;  %v878_v42 = vmul.f32 %v2237_v17, %v768_v40  ;;  %v980_v47 = vmax.f32 %v916_v37, 0.0  ;;  %v1012_v48 = vmax.f32 %v948_v38, 0.0 }
 0x14f   :  { %v642_v43 = vpop.f32.mrf.mxu0  ;;  %v770_v44 = vpop.f32.mrf.mxu1 }
 0x150   :  { %v917_v45 = vadd.f32 %v2243_v21, %v846_v41  ;;  %v949_v46 = vadd.f32 %v2243_v21, %v878_v42 }
 0x151   :  { %v645_v49 = vpop.f32.mrf.mxu0  ;;  %v773_v50 = vpop.f32.mrf.mxu1 }
 0x152   :  { %v981_v51 = vmax.f32 %v917_v45, 0.0  ;;  %v1013_v52 = vmax.f32 %v949_v46, 0.0  ;;  %v847_v53 = vmul.f32 %v2237_v17, %v645_v49  ;;  %v879_v54 = vmul.f32 %v2237_v17, %v773_v50 }
 0x153   :  { %v647_v55 = vpop.f32.mrf.mxu0  ;;  %v775_v56 = vpop.f32.mrf.mxu1 }
 0x154   :  { %v1620_v57 = vpack.c.bf16 %v981_v51, %v980_v47  ;;  %v1700_v58 = vpack.c.bf16 %v1013_v52, %v1012_v48  ;;  %v918_v59 = vadd.f32 %v2243_v21, %v847_v53  ;;  %v950_v60 = vadd.f32 %v2243_v21, %v879_v54 }
 0x155   :  { %v648_v61 = vpop.f32.mrf.mxu0  ;;  %v776_v62 = vpop.f32.mrf.mxu1 }
 0x156   :  { %1740 = vst [vmem:[#allocation2 + $0x48] sm:$0xff] %v1620_v57   ;;  %1756 = vst [vmem:[#allocation2 + $0xc8] sm:$0xff] %v1700_v58   ;;  %v848_v63 = vmul.f32 %v2237_v17, %v648_v61  ;;  %v880_v0 = vmul.f32 %v2237_v17, %v776_v62  ;;  %v982_v5 = vmax.f32 %v918_v59, 0.0  ;;  %v1014_v6 = vmax.f32 %v950_v60, 0.0 }
 0x157   :  { %v650_v1 = vpop.f32.mrf.mxu0  ;;  %v778_v2 = vpop.f32.mrf.mxu1 }
 0x158   :  { %v919_v3 = vadd.f32 %v2243_v21, %v848_v63  ;;  %v951_v4 = vadd.f32 %v2243_v21, %v880_v0 }
 0x159   :  { %v653_v7 = vpop.f32.mrf.mxu0  ;;  %v781_v8 = vpop.f32.mrf.mxu1 }
 0x15a   :  { %v983_v9 = vmax.f32 %v919_v3, 0.0  ;;  %v1015_v10 = vmax.f32 %v951_v4, 0.0  ;;  %v849_v11 = vmul.f32 %v2237_v17, %v653_v7  ;;  %v881_v12 = vmul.f32 %v2237_v17, %v781_v8 }
 0x15b   :  { %v655_v13 = vpop.f32.mrf.mxu0  ;;  %v783_v14 = vpop.f32.mrf.mxu1 }
 0x15c   :  { %v1625_v15 = vpack.c.bf16 %v983_v9, %v982_v5  ;;  %v1705_v16 = vpack.c.bf16 %v1015_v10, %v1014_v6  ;;  %v920_v18 = vadd.f32 %v2243_v21, %v849_v11  ;;  %v952_v19 = vadd.f32 %v2243_v21, %v881_v12 }
 0x15d   :  { %v656_v20 = vpop.f32.mrf.mxu0  ;;  %v784_v22 = vpop.f32.mrf.mxu1 }
 0x15e   :  { %1741 = vst [vmem:[#allocation2 + $0x50] sm:$0xff] %v1625_v15   ;;  %1757 = vst [vmem:[#allocation2 + $0xd0] sm:$0xff] %v1705_v16   ;;  %v850_v23 = vmul.f32 %v2237_v17, %v656_v20  ;;  %v882_v24 = vmul.f32 %v2237_v17, %v784_v22  ;;  %v984_v29 = vmax.f32 %v920_v18, 0.0  ;;  %v1016_v30 = vmax.f32 %v952_v19, 0.0 }
 0x15f   :  { %v658_v25 = vpop.f32.mrf.mxu0  ;;  %v786_v26 = vpop.f32.mrf.mxu1 }
 0x160   :  { %v921_v27 = vadd.f32 %v2243_v21, %v850_v23  ;;  %v953_v28 = vadd.f32 %v2243_v21, %v882_v24 }
 0x161   :  { %v661_v31 = vpop.f32.mrf.mxu0  ;;  %v789_v32 = vpop.f32.mrf.mxu1 }
 0x162   :  { %v985_v33 = vmax.f32 %v921_v27, 0.0  ;;  %v1017_v34 = vmax.f32 %v953_v28, 0.0  ;;  %v851_v35 = vmul.f32 %v2237_v17, %v661_v31  ;;  %v883_v36 = vmul.f32 %v2237_v17, %v789_v32 }
 0x163   :  { %v663_v37 = vpop.f32.mrf.mxu0  ;;  %v791_v38 = vpop.f32.mrf.mxu1 }
 0x164   :  { %v1630_v39 = vpack.c.bf16 %v985_v33, %v984_v29  ;;  %v1710_v40 = vpack.c.bf16 %v1017_v34, %v1016_v30  ;;  %v922_v41 = vadd.f32 %v2243_v21, %v851_v35  ;;  %v954_v42 = vadd.f32 %v2243_v21, %v883_v36 }
 0x165   :  { %v664_v43 = vpop.f32.mrf.mxu0  ;;  %v792_v44 = vpop.f32.mrf.mxu1 }
 0x166   :  { %1742 = vst [vmem:[#allocation2 + $0x58] sm:$0xff] %v1630_v39   ;;  %1758 = vst [vmem:[#allocation2 + $0xd8] sm:$0xff] %v1710_v40   ;;  %v852_v45 = vmul.f32 %v2237_v17, %v664_v43  ;;  %v884_v46 = vmul.f32 %v2237_v17, %v792_v44  ;;  %v986_v51 = vmax.f32 %v922_v41, 0.0  ;;  %v1018_v52 = vmax.f32 %v954_v42, 0.0 }
 0x167   :  { %v666_v47 = vpop.f32.mrf.mxu0  ;;  %v794_v48 = vpop.f32.mrf.mxu1 }
 0x168   :  { %v923_v49 = vadd.f32 %v2243_v21, %v852_v45  ;;  %v955_v50 = vadd.f32 %v2243_v21, %v884_v46 }
 0x169   :  { %v669_v53 = vpop.f32.mrf.mxu0  ;;  %v797_v54 = vpop.f32.mrf.mxu1 }
 0x16a   :  { %v987_v55 = vmax.f32 %v923_v49, 0.0  ;;  %v1019_v56 = vmax.f32 %v955_v50, 0.0  ;;  %v853_v57 = vmul.f32 %v2237_v17, %v669_v53  ;;  %v885_v58 = vmul.f32 %v2237_v17, %v797_v54 }
 0x16b   :  { %v671_v59 = vpop.f32.mrf.mxu0  ;;  %v799_v60 = vpop.f32.mrf.mxu1 }
 0x16c   :  { %v1635_v61 = vpack.c.bf16 %v987_v55, %v986_v51  ;;  %v1715_v62 = vpack.c.bf16 %v1019_v56, %v1018_v52  ;;  %v924_v63 = vadd.f32 %v2243_v21, %v853_v57  ;;  %v956_v0 = vadd.f32 %v2243_v21, %v885_v58 }
 0x16d   :  { %v672_v1 = vpop.f32.mrf.mxu0  ;;  %v800_v2 = vpop.f32.mrf.mxu1 }
 0x16e   :  { %1743 = vst [vmem:[#allocation2 + $0x60] sm:$0xff] %v1635_v61   ;;  %1759 = vst [vmem:[#allocation2 + $0xe0] sm:$0xff] %v1715_v62   ;;  %v854_v3 = vmul.f32 %v2237_v17, %v672_v1  ;;  %v886_v4 = vmul.f32 %v2237_v17, %v800_v2  ;;  %v988_v9 = vmax.f32 %v924_v63, 0.0  ;;  %v1020_v10 = vmax.f32 %v956_v0, 0.0 }
 0x16f   :  { %v674_v5 = vpop.f32.mrf.mxu0  ;;  %v802_v6 = vpop.f32.mrf.mxu1 }
 0x170   :  { %v925_v7 = vadd.f32 %v2243_v21, %v854_v3  ;;  %v957_v8 = vadd.f32 %v2243_v21, %v886_v4 }
 0x171   :  { %v677_v11 = vpop.f32.mrf.mxu0  ;;  %v805_v12 = vpop.f32.mrf.mxu1 }
 0x172   :  { %v989_v13 = vmax.f32 %v925_v7, 0.0  ;;  %v1021_v14 = vmax.f32 %v957_v8, 0.0  ;;  %v855_v15 = vmul.f32 %v2237_v17, %v677_v11  ;;  %v887_v16 = vmul.f32 %v2237_v17, %v805_v12 }
 0x173   :  { %v679_v18 = vpop.f32.mrf.mxu0  ;;  %v807_v19 = vpop.f32.mrf.mxu1 }
 0x174   :  { %v1640_v20 = vpack.c.bf16 %v989_v13, %v988_v9  ;;  %v1720_v22 = vpack.c.bf16 %v1021_v14, %v1020_v10  ;;  %v926_v23 = vadd.f32 %v2243_v21, %v855_v15  ;;  %v958_v24 = vadd.f32 %v2243_v21, %v887_v16 }
 0x175   :  { %v680_v25 = vpop.f32.mrf.mxu0  ;;  %v808_v26 = vpop.f32.mrf.mxu1 }
 0x176   :  { %1744 = vst [vmem:[#allocation2 + $0x68] sm:$0xff] %v1640_v20   ;;  %1760 = vst [vmem:[#allocation2 + $0xe8] sm:$0xff] %v1720_v22   ;;  %v856_v27 = vmul.f32 %v2237_v17, %v680_v25  ;;  %v888_v28 = vmul.f32 %v2237_v17, %v808_v26  ;;  %v990_v33 = vmax.f32 %v926_v23, 0.0  ;;  %v1022_v34 = vmax.f32 %v958_v24, 0.0 }
 0x177   :  { %v682_v29 = vpop.f32.mrf.mxu0  ;;  %v810_v30 = vpop.f32.mrf.mxu1 }
 0x178   :  { %v927_v31 = vadd.f32 %v2243_v21, %v856_v27  ;;  %v959_v32 = vadd.f32 %v2243_v21, %v888_v28 }
 0x179   :  { %v685_v35 = vpop.f32.mrf.mxu0  ;;  %v813_v36 = vpop.f32.mrf.mxu1 }
 0x17a   :  { %v991_v37 = vmax.f32 %v927_v31, 0.0  ;;  %v1023_v38 = vmax.f32 %v959_v32, 0.0  ;;  %v857_v39 = vmul.f32 %v2237_v17, %v685_v35  ;;  %v889_v40 = vmul.f32 %v2237_v17, %v813_v36 }
 0x17b   :  { %v687_v41 = vpop.f32.mrf.mxu0  ;;  %v815_v42 = vpop.f32.mrf.mxu1 }
 0x17c   :  { %v1645_v43 = vpack.c.bf16 %v991_v37, %v990_v33  ;;  %v1725_v44 = vpack.c.bf16 %v1023_v38, %v1022_v34  ;;  %v928_v47 = vadd.f32 %v2243_v21, %v857_v39  ;;  %v960_v48 = vadd.f32 %v2243_v21, %v889_v40 }
 0x17d   :  { %v688_v45 = vpop.f32.mrf.mxu0  ;;  %v816_v46 = vpop.f32.mrf.mxu1 }
 0x17e   :  { %1745 = vst [vmem:[#allocation2 + $0x70] sm:$0xff] %v1645_v43   ;;  %1761 = vst [vmem:[#allocation2 + $0xf0] sm:$0xff] %v1725_v44   ;;  %v858_v49 = vmul.f32 %v2237_v17, %v688_v45  ;;  %v890_v50 = vmul.f32 %v2237_v17, %v816_v46  ;;  %v992_v55 = vmax.f32 %v928_v47, 0.0  ;;  %v1024_v56 = vmax.f32 %v960_v48, 0.0 }
 0x17f   :  { %v690_v51 = vpop.f32.mrf.mxu0  ;;  %v818_v52 = vpop.f32.mrf.mxu1 }
 0x180   :  { %v929_v53 = vadd.f32 %v2243_v21, %v858_v49  ;;  %v961_v54 = vadd.f32 %v2243_v21, %v890_v50 }
 0x182   :  { %v993_v57 = vmax.f32 %v929_v53, 0.0  ;;  %v1025_v58 = vmax.f32 %v961_v54, 0.0 }
 0x184   :  { %v1650_v59 = vpack.c.bf16 %v993_v57, %v992_v55  ;;  %v1730_v60 = vpack.c.bf16 %v1025_v58, %v1024_v56 }
 0x186   :  { %1746 = vst [vmem:[#allocation2 + $0x78] sm:$0xff] %v1650_v59   ;;  %1762 = vst [vmem:[#allocation2 + $0xf8] sm:$0xff] %v1730_v60  }
 0x187   :  { %1922 = shalt.err (!%p1919_p4)
}
 0x188   :  { %s1935_s18 = smov 64   ;;  %s1936_s19 = smov 4  }
 0x189   :  { %1357 = dma.vmem_to_hbm [thread:$0]  %s1352_s2, 4096, %s2379_s4, [#allocation3], %s1935_s18, %s1935_s18, %s1936_s19  }
 0x18a   :  { %1931 = dma.done.wait [#allocation3], 4096  }
 0x18b   :  { %1932 = vsyncadd [#allocation3], 4294963200 }
 0x18c   :  { %1361 = vsyncpa [#allocation3], 1 }

</bundles_post_ra>
